<compile_context>
chip_gen: v7x
topology: tpu7x:2x2x1
jax: 0.10.0
libtpu: 0.0.40
codegen_flags: <defaults>
</compile_context>

<pallas_src>
import functools

import jax
import jax.numpy as jnp
from jax.experimental import pallas as pl
from jax.experimental.pallas import tpu as pltpu

EPS = 1e-5
FEAT = 128  # lane-padded feature width (== fc1_units == fc2_units)


def _batchnorm(h, gamma, beta):
    # Training-mode BatchNorm1d: per-batch mean + biased per-batch variance.
    mu = jnp.mean(h, axis=0, keepdims=True)
    d = h - mu
    var = jnp.mean(d * d, axis=0, keepdims=True)
    return d * jax.lax.rsqrt(var + EPS) * gamma + beta


def actor_kernel(x_ref, vecs_ref, w1_ref, w2_ref, w3_ref, o_ref):
    """x: (B,128) f32, vecs: (8,128) packed per-feature vectors,
    w1/w2/w3: (128,128) f32, o: (B,128) f32 (lane-dense, sliced outside)."""
    x = x_ref[...]
    v = vecs_ref[...]          # one (8,128) tile: [g1, b1, g2, b2, g3, b3, bias3, 0]
    g1, be1 = v[0:1, :], v[1:2, :]
    g2, be2 = v[2:3, :], v[3:4, :]
    g3, be3 = v[4:5, :], v[5:6, :]
    b3 = v[6:7, :]

    # BatchNorm1d(state) — padded columns are all-zero -> normalize to beta=0.
    h = _batchnorm(x, g1, be1)

    # Linear(S,128) (bias dropped: cancels in the following BN) + BN + ReLU.
    h = jnp.dot(h, w1_ref[...], preferred_element_type=jnp.float32)
    h = jnp.maximum(_batchnorm(h, g2, be2), 0.0)

    # Linear(128,128) (bias dropped) + BN + ReLU.
    h = jnp.dot(h, w2_ref[...], preferred_element_type=jnp.float32)
    h = jnp.maximum(_batchnorm(h, g3, be3), 0.0)

    # Linear(128,A) padded to 128 output lanes + Tanh. Padded lanes -> tanh(0)=0.
    h = jnp.dot(h, w3_ref[...], preferred_element_type=jnp.float32) + b3
    o_ref[...] = jnp.tanh(h).astype(o_ref.dtype)


@functools.partial(jax.jit, static_argnames=("action_size",))
def actor_forward(state, packed, action_size):
    """state: (B, state_size) f32 -> actions: (B, action_size) f32."""
    B, S = state.shape
    # Lane-pad the input to 128 features (zeros do not perturb BN cols 0..S-1
    # and contribute 0 to the first matmul since w1's padded rows are 0).
    x = jnp.pad(state, ((0, 0), (0, FEAT - S))) if S < FEAT else state

    vmem = pl.BlockSpec(memory_space=pltpu.MemorySpace.VMEM)
    out = pl.pallas_call(
        actor_kernel,
        out_shape=jax.ShapeDtypeStruct((B, FEAT), jnp.float32),
        in_specs=[vmem] * 5,
        out_specs=vmem,
        compiler_params=pltpu.CompilerParams(vmem_limit_bytes=32 * 1024 * 1024),
    )(x, packed["vecs"], packed["w1"], packed["w2"], packed["w3"])
    # Slice the lane-dense slab back to the true action width.
    return out[:, :action_size]


def init_params(key, state_size, action_size, fc1_units=128, fc2_units=128):
    """Raw (un-padded) params mirroring PyTorch defaults (shapes, not values).

    Linear: weight/bias ~ U(-1/sqrt(fan_in), 1/sqrt(fan_in)); weights stored
    pre-transposed as (in, out). BatchNorm1d: gamma=1, beta=0.
    """
    ks = jax.random.split(key, 6)

    def linear(kw, kb, fan_in, fan_out):
        bound = 1.0 / jnp.sqrt(jnp.float32(fan_in))
        w = jax.random.uniform(kw, (fan_in, fan_out), jnp.float32, -bound, bound)
        b = jax.random.uniform(kb, (1, fan_out), jnp.float32, -bound, bound)
        return w, b

    w1, b1 = linear(ks[0], ks[1], state_size, fc1_units)
    w2, b2 = linear(ks[2], ks[3], fc1_units, fc2_units)
    w3, b3 = linear(ks[4], ks[5], fc2_units, action_size)

    return dict(
        bn1_g=jnp.ones((1, state_size), jnp.float32),
        bn1_b=jnp.zeros((1, state_size), jnp.float32),
        w1=w1, b1=b1,
        bn2_g=jnp.ones((1, fc1_units), jnp.float32),
        bn2_b=jnp.zeros((1, fc1_units), jnp.float32),
        w2=w2, b2=b2,
        bn3_g=jnp.ones((1, fc2_units), jnp.float32),
        bn3_b=jnp.zeros((1, fc2_units), jnp.float32),
        w3=w3, b3=b3,
    )


def pack_params(params, state_size, action_size, fc1_units=128, fc2_units=128):
    """Lane-pad + pack raw params into the 4 kernel operands (done once)."""
    assert state_size <= FEAT and action_size <= FEAT
    assert fc1_units == FEAT and fc2_units == FEAT

    def pad_row(v):  # (1, F) -> (1, 128)
        return jnp.pad(v, ((0, 0), (0, FEAT - v.shape[1])))

    # Packed per-feature vectors: one (8,128) tile. b1/b2 intentionally
    # omitted (they cancel exactly under the following training-mode BN).
    vecs = jnp.concatenate(
        [
            pad_row(params["bn1_g"]), pad_row(params["bn1_b"]),
            pad_row(params["bn2_g"]), pad_row(params["bn2_b"]),
            pad_row(params["bn3_g"]), pad_row(params["bn3_b"]),
            pad_row(params["b3"]),
            jnp.zeros((1, FEAT), jnp.float32),
        ],
        axis=0,
    )

    w1 = jnp.pad(params["w1"], ((0, FEAT - state_size), (0, 0)))       # (128,128)
    w3 = jnp.pad(params["w3"], ((0, 0), (0, FEAT - action_size)))      # (128,128)
    return dict(vecs=vecs, w1=w1, w2=params["w2"], w3=w3)


def actor_ref(state, params):
    """Pure-JAX reference (keeps b1/b2 — proves they cancel under BN)."""
    h = _batchnorm(state, params["bn1_g"], params["bn1_b"])
    h = h @ params["w1"] + params["b1"]
    h = jnp.maximum(_batchnorm(h, params["bn2_g"], params["bn2_b"]), 0.0)
    h = h @ params["w2"] + params["b2"]
    h = jnp.maximum(_batchnorm(h, params["bn3_g"], params["bn3_b"]), 0.0)
    h = h @ params["w3"] + params["b3"]
    return jnp.tanh(h)


if __name__ == "__main__":
    key = jax.random.PRNGKey(0)
    k_x, k_p = jax.random.split(key)

    BATCH = 8
    STATE_SIZE = 32
    ACTION_SIZE = 8

    state = jax.random.normal(k_x, (BATCH, STATE_SIZE), jnp.float32)
    params = init_params(k_p, STATE_SIZE, ACTION_SIZE)
    packed = pack_params(params, STATE_SIZE, ACTION_SIZE)

    out = actor_forward(state, packed, ACTION_SIZE)
    out = jax.block_until_ready(out)

    ref = actor_ref(state, params)
    assert out.shape == (BATCH, ACTION_SIZE)
    assert jnp.all(jnp.abs(out) <= 1.0 + 1e-6)
    assert jnp.max(jnp.abs(out - ref)) < 1e-4, "mismatch vs pure-JAX reference"

    print("KERNEL_OK")
</pallas_src>

<mosaic_0001>
module attributes {stable_mosaic.version = 11 : i64} {
  func.func @actor_kernel(%arg0: memref<8x128xf32, #tpu.memory_space<vmem>>, %arg1: memref<8x128xf32, #tpu.memory_space<vmem>>, %arg2: memref<128x128xf32, #tpu.memory_space<vmem>>, %arg3: memref<128x128xf32, #tpu.memory_space<vmem>>, %arg4: memref<128x128xf32, #tpu.memory_space<vmem>>, %arg5: memref<8x128xf32, #tpu.memory_space<vmem>>) attributes {dimension_semantics = [], scalar_prefetch = 0 : i64, scratch_operands = 0 : i64, tpu.core_type = #tpu.core_type<tc>} {
    %c0 = arith.constant 0 : index
    %c0_0 = arith.constant 0 : index
    %0 = vector.load %arg0[%c0, %c0_0] : memref<8x128xf32, #tpu.memory_space<vmem>>, vector<8x128xf32>
    %c0_1 = arith.constant 0 : index
    %c0_2 = arith.constant 0 : index
    %1 = vector.load %arg1[%c0_1, %c0_2] : memref<8x128xf32, #tpu.memory_space<vmem>>, vector<8x128xf32>
    %2 = vector.extract_strided_slice %1 {offsets = [0, 0], sizes = [1, 128], strides = [1, 1]} : vector<8x128xf32> to vector<1x128xf32>
    %3 = vector.extract_strided_slice %1 {offsets = [1, 0], sizes = [1, 128], strides = [1, 1]} : vector<8x128xf32> to vector<1x128xf32>
    %4 = vector.extract_strided_slice %1 {offsets = [2, 0], sizes = [1, 128], strides = [1, 1]} : vector<8x128xf32> to vector<1x128xf32>
    %5 = vector.extract_strided_slice %1 {offsets = [3, 0], sizes = [1, 128], strides = [1, 1]} : vector<8x128xf32> to vector<1x128xf32>
    %6 = vector.extract_strided_slice %1 {offsets = [4, 0], sizes = [1, 128], strides = [1, 1]} : vector<8x128xf32> to vector<1x128xf32>
    %7 = vector.extract_strided_slice %1 {offsets = [5, 0], sizes = [1, 128], strides = [1, 1]} : vector<8x128xf32> to vector<1x128xf32>
    %8 = vector.extract_strided_slice %1 {offsets = [6, 0], sizes = [1, 128], strides = [1, 1]} : vector<8x128xf32> to vector<1x128xf32>
    %cst = arith.constant dense<0.000000e+00> : vector<128xf32>
    %9 = vector.multi_reduction <add>, %0, %cst [0] : vector<8x128xf32> to vector<128xf32>
    %10 = vector.shape_cast %9 : vector<128xf32> to vector<1x128xf32>
    %cst_3 = arith.constant 8.000000e+00 : f32
    %11 = vector.broadcast %cst_3 : f32 to vector<1x128xf32>
    %12 = arith.divf %10, %11 : vector<1x128xf32>
    %13 = vector.broadcast %12 : vector<1x128xf32> to vector<8x128xf32>
    %14 = arith.subf %0, %13 : vector<8x128xf32>
    %15 = arith.mulf %14, %14 : vector<8x128xf32>
    %cst_4 = arith.constant dense<0.000000e+00> : vector<128xf32>
    %16 = vector.multi_reduction <add>, %15, %cst_4 [0] : vector<8x128xf32> to vector<128xf32>
    %17 = vector.shape_cast %16 : vector<128xf32> to vector<1x128xf32>
    %cst_5 = arith.constant 8.000000e+00 : f32
    %18 = vector.broadcast %cst_5 : f32 to vector<1x128xf32>
    %19 = arith.divf %17, %18 : vector<1x128xf32>
    %cst_6 = arith.constant 9.99999974E-6 : f32
    %20 = vector.broadcast %cst_6 : f32 to vector<1x128xf32>
    %21 = arith.addf %19, %20 : vector<1x128xf32>
    %22 = math.rsqrt %21 : vector<1x128xf32>
    %23 = vector.broadcast %22 : vector<1x128xf32> to vector<8x128xf32>
    %24 = arith.mulf %14, %23 : vector<8x128xf32>
    %25 = vector.broadcast %2 : vector<1x128xf32> to vector<8x128xf32>
    %26 = arith.mulf %24, %25 : vector<8x128xf32>
    %27 = vector.broadcast %3 : vector<1x128xf32> to vector<8x128xf32>
    %28 = arith.addf %26, %27 : vector<8x128xf32>
    %c0_7 = arith.constant 0 : index
    %c0_8 = arith.constant 0 : index
    %29 = vector.load %arg2[%c0_7, %c0_8] : memref<128x128xf32, #tpu.memory_space<vmem>>, vector<128x128xf32>
    %cst_9 = arith.constant dense<0.000000e+00> : vector<8x128xf32>
    %30 = tpu.matmul %28, %29, %cst_9 {dimension_numbers = #tpu.dot_dimension_numbers<[1], [0], [0], [1], [0, 0, 1, 1], [], []>} : vector<8x128xf32>, vector<128x128xf32>, vector<8x128xf32> -> vector<8x128xf32>
    %cst_10 = arith.constant dense<0.000000e+00> : vector<128xf32>
    %31 = vector.multi_reduction <add>, %30, %cst_10 [0] : vector<8x128xf32> to vector<128xf32>
    %32 = vector.shape_cast %31 : vector<128xf32> to vector<1x128xf32>
    %cst_11 = arith.constant 8.000000e+00 : f32
    %33 = vector.broadcast %cst_11 : f32 to vector<1x128xf32>
    %34 = arith.divf %32, %33 : vector<1x128xf32>
    %35 = vector.broadcast %34 : vector<1x128xf32> to vector<8x128xf32>
    %36 = arith.subf %30, %35 : vector<8x128xf32>
    %37 = arith.mulf %36, %36 : vector<8x128xf32>
    %cst_12 = arith.constant dense<0.000000e+00> : vector<128xf32>
    %38 = vector.multi_reduction <add>, %37, %cst_12 [0] : vector<8x128xf32> to vector<128xf32>
    %39 = vector.shape_cast %38 : vector<128xf32> to vector<1x128xf32>
    %cst_13 = arith.constant 8.000000e+00 : f32
    %40 = vector.broadcast %cst_13 : f32 to vector<1x128xf32>
    %41 = arith.divf %39, %40 : vector<1x128xf32>
    %cst_14 = arith.constant 9.99999974E-6 : f32
    %42 = vector.broadcast %cst_14 : f32 to vector<1x128xf32>
    %43 = arith.addf %41, %42 : vector<1x128xf32>
    %44 = math.rsqrt %43 : vector<1x128xf32>
    %45 = vector.broadcast %44 : vector<1x128xf32> to vector<8x128xf32>
    %46 = arith.mulf %36, %45 : vector<8x128xf32>
    %47 = vector.broadcast %4 : vector<1x128xf32> to vector<8x128xf32>
    %48 = arith.mulf %46, %47 : vector<8x128xf32>
    %49 = vector.broadcast %5 : vector<1x128xf32> to vector<8x128xf32>
    %50 = arith.addf %48, %49 : vector<8x128xf32>
    %cst_15 = arith.constant 0.000000e+00 : f32
    %51 = vector.broadcast %cst_15 : f32 to vector<8x128xf32>
    %52 = arith.maximumf %50, %51 : vector<8x128xf32>
    %c0_16 = arith.constant 0 : index
    %c0_17 = arith.constant 0 : index
    %53 = vector.load %arg3[%c0_16, %c0_17] : memref<128x128xf32, #tpu.memory_space<vmem>>, vector<128x128xf32>
    %cst_18 = arith.constant dense<0.000000e+00> : vector<8x128xf32>
    %54 = tpu.matmul %52, %53, %cst_18 {dimension_numbers = #tpu.dot_dimension_numbers<[1], [0], [0], [1], [0, 0, 1, 1], [], []>} : vector<8x128xf32>, vector<128x128xf32>, vector<8x128xf32> -> vector<8x128xf32>
    %cst_19 = arith.constant dense<0.000000e+00> : vector<128xf32>
    %55 = vector.multi_reduction <add>, %54, %cst_19 [0] : vector<8x128xf32> to vector<128xf32>
    %56 = vector.shape_cast %55 : vector<128xf32> to vector<1x128xf32>
    %cst_20 = arith.constant 8.000000e+00 : f32
    %57 = vector.broadcast %cst_20 : f32 to vector<1x128xf32>
    %58 = arith.divf %56, %57 : vector<1x128xf32>
    %59 = vector.broadcast %58 : vector<1x128xf32> to vector<8x128xf32>
    %60 = arith.subf %54, %59 : vector<8x128xf32>
    %61 = arith.mulf %60, %60 : vector<8x128xf32>
    %cst_21 = arith.constant dense<0.000000e+00> : vector<128xf32>
    %62 = vector.multi_reduction <add>, %61, %cst_21 [0] : vector<8x128xf32> to vector<128xf32>
    %63 = vector.shape_cast %62 : vector<128xf32> to vector<1x128xf32>
    %cst_22 = arith.constant 8.000000e+00 : f32
    %64 = vector.broadcast %cst_22 : f32 to vector<1x128xf32>
    %65 = arith.divf %63, %64 : vector<1x128xf32>
    %cst_23 = arith.constant 9.99999974E-6 : f32
    %66 = vector.broadcast %cst_23 : f32 to vector<1x128xf32>
    %67 = arith.addf %65, %66 : vector<1x128xf32>
    %68 = math.rsqrt %67 : vector<1x128xf32>
    %69 = vector.broadcast %68 : vector<1x128xf32> to vector<8x128xf32>
    %70 = arith.mulf %60, %69 : vector<8x128xf32>
    %71 = vector.broadcast %6 : vector<1x128xf32> to vector<8x128xf32>
    %72 = arith.mulf %70, %71 : vector<8x128xf32>
    %73 = vector.broadcast %7 : vector<1x128xf32> to vector<8x128xf32>
    %74 = arith.addf %72, %73 : vector<8x128xf32>
    %cst_24 = arith.constant 0.000000e+00 : f32
    %75 = vector.broadcast %cst_24 : f32 to vector<8x128xf32>
    %76 = arith.maximumf %74, %75 : vector<8x128xf32>
    %c0_25 = arith.constant 0 : index
    %c0_26 = arith.constant 0 : index
    %77 = vector.load %arg4[%c0_25, %c0_26] : memref<128x128xf32, #tpu.memory_space<vmem>>, vector<128x128xf32>
    %cst_27 = arith.constant dense<0.000000e+00> : vector<8x128xf32>
    %78 = tpu.matmul %76, %77, %cst_27 {dimension_numbers = #tpu.dot_dimension_numbers<[1], [0], [0], [1], [0, 0, 1, 1], [], []>} : vector<8x128xf32>, vector<128x128xf32>, vector<8x128xf32> -> vector<8x128xf32>
    %79 = vector.broadcast %8 : vector<1x128xf32> to vector<8x128xf32>
    %80 = arith.addf %78, %79 : vector<8x128xf32>
    %81 = math.tanh %80 : vector<8x128xf32>
    %c0_28 = arith.constant 0 : index
    %c0_29 = arith.constant 0 : index
    %82 = vector.load %arg5[%c0_28, %c0_29] : memref<8x128xf32, #tpu.memory_space<vmem>>, vector<8x128xf32>
    tpu.vector_store %arg5[%c0_28, %c0_29], %81 {strides = array<i32>} : memref<8x128xf32, #tpu.memory_space<vmem>>, vector<8x128xf32>,
    return
  }
}

</mosaic_0001>

<bundles_post_ra>
// kernel: actor_forward.1
= control target key start
LH: loop header
LB: loop body
LE: loop exit
PB: predicated region body
PF: predicated region fallthrough
CT: control target
= control target key end

     0   :  { %10 = vsyncpa [#allocation3], 0  ;;  %s930_s0 = inlined_call_operand.vmem [shape: f32[8,128], index: 0, kind: input, shape index: {}]   ;;  %s931_s1 = inlined_call_operand.vmem [shape: f32[8,128], index: 1, kind: input, shape index: {}]   ;;  %s932_s2 = inlined_call_operand.hbm [shape: f32[128,128], index: 2, kind: input, shape index: {}]   ;;  %s933_s3 = inlined_call_operand.hbm [shape: f32[128,128], index: 3, kind: input, shape index: {}]   ;;  %s934_s4 = inlined_call_operand.hbm [shape: f32[128,128], index: 4, kind: input, shape index: {}]   ;;  %s935_s5 = inlined_call_operand.hbm [shape: f32[8,128], index: 5, kind: output, shape index: {}]  }
   0x1   :  { %11 = vsyncpa [#allocation6], 0 }
   0x2   :  { %12 = vsyncpa [#allocation4], 0  ;;  %s773_s18 = smov [#allocation5]   ;;  %s774_s20 = smov [#allocation2]  }
   0x3   :  { %s34_s19 = sshll.u32 %s773_s18, 4  ;;  %s22_s21 = sshll.u32 %s774_s20, 4  ;;  %s35_s19 = int_to_ptr.vmem [resolvable:$true] %s34_s19  ;;  %s812_s21 = int_to_ptr.vmem [resolvable:$true] %s22_s21 }
   0x4   :  { %s679_s24 = scalar_lea.hbm %s933_s3, 2048 }
   0x5   :  { %p680_p0 = scmp.ne.s32.totalorder %s933_s3, %s679_s24  ;;  %p683_p1 = scmp.lt.u32.totalorder %s679_s24, %s933_s3 }
   0x7   :  { %p685_p2 = pnand %p683_p1, %p680_p0 }
   0x9   :  { %688 = shalt.err (!%p685_p2)
}
   0xa   :  { %s689_s29 = scalar_lea.vmem %s35_s19, 2048  ;;  %p694_p4 = scmp.lt.s32.totalorder %s35_s19, %s35_s19 }
   0xb   :  { %p690_p3 = scmp.ne.s32.totalorder %s35_s19, %s689_s29  ;;  %p695_p5 = scmp.lt.s32.totalorder %s689_s29, %s689_s29 }
   0xd   :  { %p696_p6 = por %p695_p5, %p694_p4 }
   0xf   :  { %p697_p7 = pnand %p696_p6, %p690_p3 }
  0x11   :  { %700 = shalt.err (!%p697_p7)
}
  0x12   :  { %s775_s30 = smov 128   ;;  %s776_s6 = smov 8  }
  0x13   :  { %40 = dma.hbm_to_vmem [thread:$0]  %s933_s3, 2048, %s35_s19, [#allocation6], %s775_s30, %s775_s30, %s776_s6  }
  0x14   :  { %s701_s11 = scalar_lea.hbm %s932_s2, 2048 }
  0x15   :  { %p702_p8 = scmp.ne.s32.totalorder %s932_s2, %s701_s11  ;;  %p705_p9 = scmp.lt.u32.totalorder %s701_s11, %s932_s2 }
  0x17   :  { %p707_p10 = pnand %p705_p9, %p702_p8 }
  0x19   :  { %710 = shalt.err (!%p707_p10)
}
  0x1a   :  { %s711_s16 = scalar_lea.vmem %s812_s21, 2048  ;;  %p716_p12 = scmp.lt.s32.totalorder %s812_s21, %s812_s21 }
  0x1b   :  { %p712_p11 = scmp.ne.s32.totalorder %s812_s21, %s711_s16  ;;  %p717_p13 = scmp.lt.s32.totalorder %s711_s16, %s711_s16 }
  0x1d   :  { %p718_p0 = por %p717_p13, %p716_p12 }
  0x1f   :  { %p719_p1 = pnand %p718_p0, %p712_p11 }
  0x21   :  { %722 = shalt.err (!%p719_p1)
}
  0x22   :  { %28 = dma.hbm_to_vmem [thread:$0]  %s932_s2, 2048, %s812_s21, [#allocation3], %s775_s30, %s775_s30, %s776_s6  }
  0x23   :  { %s777_s18 = smov [#allocation7]   ;;  %s723_s23 = scalar_lea.hbm %s934_s4, 2048 }
  0x24   :  { %s46_s19 = sshll.u32 %s777_s18, 4  ;;  %p724_p2 = scmp.ne.s32.totalorder %s934_s4, %s723_s23  ;;  %s47_s19 = int_to_ptr.vmem [resolvable:$true] %s46_s19 }
  0x25   :  { %p727_p3 = scmp.lt.u32.totalorder %s723_s23, %s934_s4 }
  0x27   :  { %p729_p4 = pnand %p727_p3, %p724_p2 }
  0x29   :  { %732 = shalt.err (!%p729_p4)
}
  0x2a   :  { %s733_s28 = scalar_lea.vmem %s47_s19, 2048  ;;  %p738_p6 = scmp.lt.s32.totalorder %s47_s19, %s47_s19 }
  0x2b   :  { %p734_p5 = scmp.ne.s32.totalorder %s47_s19, %s733_s28  ;;  %p739_p7 = scmp.lt.s32.totalorder %s733_s28, %s733_s28 }
  0x2d   :  { %p740_p8 = por %p739_p7, %p738_p6 }
  0x2f   :  { %p741_p9 = pnand %p740_p8, %p734_p5 }
  0x31   :  { %744 = shalt.err (!%p741_p9)
}
  0x32   :  { %52 = dma.hbm_to_vmem [thread:$0]  %s934_s4, 2048, %s47_s19, [#allocation6], %s775_s30, %s775_s30, %s776_s6  }
  0x33   :  { %767 = dma.done.wait [#allocation3], 2048  }
  0x34   :  { %768 = vsyncadd [#allocation3], 4294965248 }
  0x35   :  { %769 = dma.done.wait [#allocation6], 4096  }
  0x36   :  { %770 = vsyncadd [#allocation6], 4294963200  ;;  %v778_v0 = vmov 0.0|0.0   ;;  %vm779_vm0 = vmmov 0   ;;  %v780_v1 = vmov 0.0   ;;  %v94_v2 = vld [vmem:[#allocation2] sm:$0xff]  ;;  %v84_v43 = vlaneseq }
  0x37   :  { %590 = vmatprep.subr.bf16.mxu0 %v778_v0  ;;  %517 = vmatprep.mubr.msk.f32.mxu0 %vm779_vm0, %v780_v1  ;;  %v95_v3 = vld [vmem:[#allocation2 + $0x8] sm:$0xff]  ;;  %v96_v4 = vld [vmem:[#allocation2 + $0x10] sm:$0xff]  ;;  %v97_v6 = vld [vmem:[#allocation2 + $0x18] sm:$0xff] }
  0x38   :  { %614 = vmatprep.subr.bf16.mxu1 %v778_v0  ;;  %552 = vmatprep.mubr.msk.f32.mxu1 %vm779_vm0, %v780_v1  ;;  %v591_v5 = vpack.c.bf16 %v95_v3, %v94_v2  ;;  %v594_v7 = vpack.c.bf16 %v97_v6, %v96_v4  ;;  %v98_v8 = vld [vmem:[#allocation2 + $0x20] sm:$0xff]  ;;  %v99_v9 = vld [vmem:[#allocation2 + $0x28] sm:$0xff]  ;;  %v62_v10 = vld [vmem:[%s930_s0] sm:$0xff]  ;;  %v881_v45 = vshrl.u32 %v84_v43, 7 }
  0x39   :  { %v64_v11 = vrot.slane %v62_v10, 4  ;;  %v597_v12 = vpack.c.bf16 %v99_v9, %v98_v8  ;;  %v100_v13 = vld [vmem:[#allocation2 + $0x30] sm:$0xff]  ;;  %v101_v14 = vld [vmem:[#allocation2 + $0x38] sm:$0xff]  ;;  %v102_v18 = vld [vmem:[#allocation2 + $0x40] sm:$0xff] }
  0x3a   :  { %592 = vmatpush3.bf16.msra.mxu0 %v591_v5  ;;  %v600_v17 = vpack.c.bf16 %v101_v14, %v100_v13  ;;  %v103_v19 = vld [vmem:[#allocation2 + $0x48] sm:$0xff]  ;;  %v104_v23 = vld [vmem:[#allocation2 + $0x50] sm:$0xff]  ;;  %v105_v24 = vld [vmem:[#allocation2 + $0x58] sm:$0xff]  ;;  %v86_v46 = vsub.s32 0, %v881_v45  ;;  %v91_v48 = vsub.s32 1, %v881_v45 }
  0x3b   :  { %593 = vmatprep.subr.bf16.mxu0 %v778_v0  ;;  %v65_v15 = vadd.f32 %v64_v11, %v62_v10  ;;  %v603_v22 = vpack.c.bf16 %v103_v19, %v102_v18  ;;  %v606_v27 = vpack.c.bf16 %v105_v24, %v104_v23  ;;  %v106_v28 = vld [vmem:[#allocation2 + $0x60] sm:$0xff]  ;;  %v107_v29 = vld [vmem:[#allocation2 + $0x68] sm:$0xff]  ;;  %v108_v33 = vld [vmem:[#allocation2 + $0x70] sm:$0xff] }
  0x3c   :  { %v609_v32 = vpack.c.bf16 %v107_v29, %v106_v28  ;;  %v109_v34 = vld [vmem:[#allocation2 + $0x78] sm:$0xff]  ;;  %v887_v47 = vld [vmem:[%s931_s1] sm:$0xff]  ;;  %v210_v55 = vld [vmem:[#allocation5] sm:$0xff]  ;;  %s781_s1 = smov [#allocation8]  }
  0x3d   :  { %v66_v16 = vrot.slane %v65_v15, 2  ;;  %v612_v37 = vpack.c.bf16 %v109_v34, %v108_v33  ;;  %v87_v49 = vrot.slane %v887_v47, %v86_v46  ;;  %v92_v52 = vrot.slane %v887_v47, %v91_v48  ;;  %v211_v56 = vld [vmem:[#allocation5 + $0x8] sm:$0xff]  ;;  %v212_v58 = vld [vmem:[#allocation5 + $0x10] sm:$0xff]  ;;  %v213_v59 = vld [vmem:[#allocation5 + $0x18] sm:$0xff]  ;;  %s424_s6 = sshll.u32 %s781_s1, 4  ;;  %s425_s6 = int_to_ptr.vmem [resolvable:$true] %s424_s6 }
  0x3e   :  { %595 = vmatpush3.bf16.msra.mxu0 %v594_v7  ;;  %v615_v57 = vpack.c.bf16 %v211_v56, %v210_v55  ;;  %v618_v60 = vpack.c.bf16 %v213_v59, %v212_v58  ;;  %v214_v61 = vld [vmem:[#allocation5 + $0x20] sm:$0xff]  ;;  %v215_v62 = vld [vmem:[#allocation5 + $0x28] sm:$0xff]  ;;  %v216_v2 = vld [vmem:[#allocation5 + $0x30] sm:$0xff]  ;;  %s745_s7 = scalar_lea.vmem %s425_s6, 128  ;;  %p750_p11 = scmp.lt.s32.totalorder %s425_s6, %s425_s6 }
  0x3f   :  { %596 = vmatprep.subr.bf16.mxu0 %v778_v0  ;;  %v67_v20 = vadd.f32 %v66_v16, %v65_v15  ;;  %v621_v63 = vpack.c.bf16 %v215_v62, %v214_v61  ;;  %v218_v4 = vld [vmem:[#allocation5 + $0x40] sm:$0xff]  ;;  %v219_v5 = vld [vmem:[#allocation5 + $0x48] sm:$0xff]  ;;  %v220_v7 = vld [vmem:[#allocation5 + $0x50] sm:$0xff]  ;;  %p746_p10 = scmp.ne.s32.totalorder %s425_s6, %s745_s7  ;;  %p751_p12 = scmp.lt.s32.totalorder %s745_s7, %s745_s7 }
  0x40   :  { %616 = vmatpush3.bf16.msra.mxu1 %v615_v57  ;;  %v627_v6 = vpack.c.bf16 %v219_v5, %v218_v4  ;;  %v221_v8 = vld [vmem:[#allocation5 + $0x58] sm:$0xff]  ;;  %v223_v11 = vld [vmem:[#allocation5 + $0x68] sm:$0xff]  ;;  %v224_v13 = vld [vmem:[#allocation5 + $0x70] sm:$0xff] }
  0x41   :  { %v68_v21 = vrot.slane %v67_v20, 1  ;;  %617 = vmatprep.subr.bf16.mxu1 %v778_v0  ;;  %v630_v9 = vpack.c.bf16 %v221_v8, %v220_v7  ;;  %v225_v14 = vld [vmem:[#allocation5 + $0x78] sm:$0xff]  ;;  %v327_v46 = vld [vmem:[#allocation7 + $0x8] sm:$0xff]  ;;  %v332_v55 = vld [vmem:[#allocation7 + $0x30] sm:$0xff]  ;;  %p752_p13 = por %p751_p12, %p750_p11 }
  0x42   :  { %598 = vmatpush3.bf16.msra.mxu0 %v597_v12  ;;  %v636_v15 = vpack.c.bf16 %v225_v14, %v224_v13  ;;  %v333_v56 = vld [vmem:[#allocation7 + $0x38] sm:$0xff]  ;;  %v334_v58 = vld [vmem:[#allocation7 + $0x40] sm:$0xff]  ;;  %v335_v59 = vld [vmem:[#allocation7 + $0x48] sm:$0xff] }
  0x43   :  { %599 = vmatprep.subr.bf16.mxu0 %v778_v0  ;;  %v69_v25 = vadd.f32 %v68_v21, %v67_v20  ;;  %v648_v57 = vpack.c.bf16 %v333_v56, %v332_v55  ;;  %v336_v61 = vld [vmem:[#allocation7 + $0x50] sm:$0xff]  ;;  %v337_v62 = vld [vmem:[#allocation7 + $0x58] sm:$0xff]  ;;  %p753_p0 = pnand %p752_p13, %p746_p10 }
  0x44   :  { %619 = vmatpush3.bf16.msra.mxu1 %v618_v60  ;;  %v651_v60 = vpack.c.bf16 %v335_v59, %v334_v58  ;;  %v340_v4 = vld [vmem:[#allocation7 + $0x70] sm:$0xff]  ;;  %v341_v5 = vld [vmem:[#allocation7 + $0x78] sm:$0xff] }
  0x45   :  { %v71_v26 = vmul.f32 0.125, %v69_v25  ;;  %620 = vmatprep.subr.bf16.mxu1 %v778_v0 }
  0x46   :  { %601 = vmatpush3.bf16.msra.mxu0 %v600_v17 }
  0x47   :  { %602 = vmatprep.subr.bf16.mxu0 %v778_v0  ;;  %v72_v30 = vsub.f32 %v62_v10, %v71_v26  ;;  %v222_v10 = vld [vmem:[#allocation5 + $0x60] sm:$0xff] }
  0x48   :  { %622 = vmatpush3.bf16.msra.mxu1 %v621_v63  ;;  %v633_v12 = vpack.c.bf16 %v223_v11, %v222_v10  ;;  %v654_v63 = vpack.c.bf16 %v337_v62, %v336_v61 }
  0x49   :  { %v73_v31 = vmul.f32 %v72_v30, %v72_v30  ;;  %623 = vmatprep.subr.bf16.mxu1 %v778_v0 }
  0x4a   :  { %604 = vmatpush3.bf16.msra.mxu0 %v603_v22 }
  0x4b   :  { %605 = vmatprep.subr.bf16.mxu0 %v778_v0  ;;  %v74_v35 = vrot.slane %v73_v31, 4 }
  0x4d   :  { %v75_v36 = vadd.f32 %v74_v35, %v73_v31  ;;  %v201_v35 = vsub.s32 2, %v881_v45 }
  0x4e   :  { %607 = vmatpush3.bf16.msra.mxu0 %v606_v27 }
  0x4f   :  { %608 = vmatprep.subr.bf16.mxu0 %v778_v0  ;;  %v76_v38 = vrot.slane %v75_v36, 2 }
  0x51   :  { %v77_v39 = vadd.f32 %v76_v38, %v75_v36  ;;  %v206_v36 = vsub.s32 3, %v881_v45 }
  0x52   :  { %610 = vmatpush3.bf16.msra.mxu0 %v609_v32 }
  0x53   :  { %611 = vmatprep.subr.bf16.mxu0 %v778_v0  ;;  %v78_v40 = vrot.slane %v77_v39, 1 }
  0x55   :  { %v79_v41 = vadd.f32 %v78_v40, %v77_v39  ;;  %v207_v40 = vrot.slane %v887_v47, %v206_v36 }
  0x56   :  { %613 = vmatpush3.bf16.msra.mxu0 %v612_v37  ;;  %v202_v37 = vrot.slane %v887_v47, %v201_v35 }
  0x57   :  { %638 = vmatprep.subr.bf16.mxu0 %v778_v0  ;;  %v80_v42 = vmul.f32 0.125, %v79_v41 }
  0x59   :  { %v81_v44 = vadd.f32 1e-05, %v80_v42 }
  0x5b   :  { %671 = vrsqrt.f32 %v81_v44  ;;  %v326_v44 = vld [vmem:[#allocation7] sm:$0xff] }
  0x5c   :  { %v639_v48 = vpack.c.bf16 %v327_v46, %v326_v44 }
  0x65   :  { %v672_v50 = vpop.eup %671 }
  0x66   :  { %v83_v51 = vmul.f32 %v672_v50, %v72_v30  ;;  %v329_v50 = vld [vmem:[#allocation7 + $0x18] sm:$0xff] }
  0x68   :  { %v88_v53 = vmul.f32 %v87_v49, %v83_v51  ;;  %v328_v49 = vld [vmem:[#allocation7 + $0x10] sm:$0xff] }
  0x69   :  { %v642_v51 = vpack.c.bf16 %v329_v50, %v328_v49 }
  0x6a   :  { %v93_v54 = vadd.f32 %v92_v52, %v88_v53  ;;  %v330_v52 = vld [vmem:[#allocation7 + $0x20] sm:$0xff]  ;;  %v331_v53 = vld [vmem:[#allocation7 + $0x28] sm:$0xff] }
  0x6c   :  { %518 = vmatmul.mubr.f32.vlgmr.msra.gmra.mrb[0].mxu0 %v93_v54  ;;  %v645_v54 = vpack.c.bf16 %v331_v53, %v330_v52 }
  0x6d   :  { %587 = vmatprep.mubr.msk.f32.mxu0 %vm779_vm0, %v780_v1  ;;  %v217_v1 = vld [vmem:[#allocation5 + $0x38] sm:$0xff]  ;;  %640 = vmatpush3.bf16.msra.mxu0 %v639_v48 }
  0x6e   :  { %v624_v3 = vpack.c.bf16 %v217_v1, %v216_v2  ;;  %641 = vmatprep.subr.bf16.mxu0 %v778_v0  ;;  %v338_v2 = vld [vmem:[#allocation7 + $0x60] sm:$0xff]  ;;  %v339_v1 = vld [vmem:[#allocation7 + $0x68] sm:$0xff] }
  0x70   :  { %625 = vmatpush3.bf16.msra.mxu1 %v624_v3  ;;  %v657_v3 = vpack.c.bf16 %v339_v1, %v338_v2 }
  0x71   :  { %626 = vmatprep.subr.bf16.mxu1 %v778_v0  ;;  %643 = vmatpush3.bf16.msra.mxu0 %v642_v51 }
  0x72   :  { %644 = vmatprep.subr.bf16.mxu0 %v778_v0 }
  0x74   :  { %628 = vmatpush3.bf16.msra.mxu1 %v627_v6  ;;  %v660_v6 = vpack.c.bf16 %v341_v5, %v340_v4 }
  0x75   :  { %629 = vmatprep.subr.bf16.mxu1 %v778_v0  ;;  %646 = vmatpush3.bf16.msra.mxu0 %v645_v54 }
  0x76   :  { %647 = vmatprep.subr.bf16.mxu0 %v778_v0 }
  0x78   :  { %631 = vmatpush3.bf16.msra.mxu1 %v630_v9 }
  0x79   :  { %632 = vmatprep.subr.bf16.mxu1 %v778_v0  ;;  %649 = vmatpush3.bf16.msra.mxu0 %v648_v57 }
  0x7a   :  { %650 = vmatprep.subr.bf16.mxu0 %v778_v0 }
  0x7c   :  { %634 = vmatpush3.bf16.msra.mxu1 %v633_v12 }
  0x7d   :  { %635 = vmatprep.subr.bf16.mxu1 %v778_v0  ;;  %652 = vmatpush3.bf16.msra.mxu0 %v651_v60 }
  0x7e   :  { %653 = vmatprep.subr.bf16.mxu0 %v778_v0 }
  0x80   :  { %637 = vmatpush3.bf16.msra.mxu1 %v636_v15 }
  0x81   :  { %655 = vmatpush3.bf16.msra.mxu0 %v654_v63 }
  0x82   :  { %656 = vmatprep.subr.bf16.mxu0 %v778_v0 }
  0x85   :  { %658 = vmatpush3.bf16.msra.mxu0 %v657_v3 }
  0x86   :  { %659 = vmatprep.subr.bf16.mxu0 %v778_v0 }
  0x89   :  { %661 = vmatpush3.bf16.msra.mxu0 %v660_v6 }
 0x13f   :  { %v176_v16 = vpop.f32.mrb[0].mxu0 }
 0x140   :  { %v180_v17 = vrot.slane %v176_v16, 4  ;;  %v519_v18 = vpop.f32.mrb[1].mxu0 }
 0x142   :  { %v181_v19 = vadd.f32 %v180_v17, %v176_v16 }
 0x144   :  { %v182_v20 = vrot.slane %v181_v19, 2 }
 0x146   :  { %v183_v21 = vadd.f32 %v182_v20, %v181_v19 }
 0x148   :  { %v184_v22 = vrot.slane %v183_v21, 1 }
 0x14a   :  { %v185_v23 = vadd.f32 %v184_v22, %v183_v21 }
 0x14c   :  { %v186_v24 = vmul.f32 0.125, %v185_v23 }
 0x14e   :  { %v187_v25 = vsub.f32 %v176_v16, %v186_v24 }
 0x150   :  { %v188_v26 = vmul.f32 %v187_v25, %v187_v25 }
 0x152   :  { %v189_v27 = vrot.slane %v188_v26, 4 }
 0x154   :  { %v190_v28 = vadd.f32 %v189_v27, %v188_v26  ;;  %v322_v26 = vsub.s32 5, %v881_v45 }
 0x156   :  { %v191_v29 = vrot.slane %v190_v28, 2 }
 0x158   :  { %v192_v30 = vadd.f32 %v191_v29, %v190_v28 }
 0x15a   :  { %v193_v31 = vrot.slane %v192_v30, 1 }
 0x15c   :  { %v194_v32 = vadd.f32 %v193_v31, %v192_v30  ;;  %v323_v30 = vrot.slane %v887_v47, %v322_v26 }
 0x15e   :  { %v195_v33 = vmul.f32 0.125, %v194_v32 }
 0x160   :  { %v196_v34 = vadd.f32 1e-05, %v195_v33 }
 0x162   :  { %673 = vrsqrt.f32 %v196_v34  ;;  %v344_v34 = vsub.s32 6, %v881_v45 }
 0x164   :  { %v345_v35 = vrot.slane %v887_v47, %v344_v34 }
 0x16c   :  { %v674_v38 = vpop.eup %673 }
 0x16d   :  { %v198_v39 = vmul.f32 %v674_v38, %v187_v25  ;;  %v317_v25 = vsub.s32 4, %v881_v45 }
 0x16f   :  { %v203_v41 = vmul.f32 %v202_v37, %v198_v39  ;;  %v318_v27 = vrot.slane %v887_v47, %v317_v25 }
 0x171   :  { %v208_v42 = vadd.f32 %v207_v40, %v203_v41 }
 0x173   :  { %v209_v43 = vmax.f32 %v208_v42, 0.0 }
 0x175   :  { %553 = vmatmul.mubr.f32.vlgmr.msra.gmra.mrb[0].mxu1 %v209_v43 }
 0x248   :  { %v292_v7 = vpop.f32.mrb[0].mxu1 }
 0x249   :  { %v296_v8 = vrot.slane %v292_v7, 4  ;;  %v554_v9 = vpop.f32.mrb[1].mxu1 }
 0x24b   :  { %v297_v10 = vadd.f32 %v296_v8, %v292_v7 }
 0x24d   :  { %v298_v11 = vrot.slane %v297_v10, 2 }
 0x24f   :  { %v299_v12 = vadd.f32 %v298_v11, %v297_v10 }
 0x251   :  { %v300_v13 = vrot.slane %v299_v12, 1 }
 0x253   :  { %v301_v14 = vadd.f32 %v300_v13, %v299_v12 }
 0x255   :  { %v302_v15 = vmul.f32 0.125, %v301_v14 }
 0x257   :  { %v303_v16 = vsub.f32 %v292_v7, %v302_v15 }
 0x259   :  { %v304_v17 = vmul.f32 %v303_v16, %v303_v16 }
 0x25b   :  { %v305_v18 = vrot.slane %v304_v17, 4 }
 0x25d   :  { %v306_v19 = vadd.f32 %v305_v18, %v304_v17 }
 0x25f   :  { %v307_v20 = vrot.slane %v306_v19, 2 }
 0x261   :  { %v308_v21 = vadd.f32 %v307_v20, %v306_v19 }
 0x263   :  { %v309_v0 = vrot.slane %v308_v21, 1 }
 0x265   :  { %v310_v22 = vadd.f32 %v309_v0, %v308_v21 }
 0x267   :  { %v311_v23 = vmul.f32 0.125, %v310_v22 }
 0x269   :  { %v312_v24 = vadd.f32 1e-05, %v311_v23 }
 0x26b   :  { %675 = vrsqrt.f32 %v312_v24 }
 0x275   :  { %v676_v28 = vpop.eup %675 }
 0x276   :  { %v314_v29 = vmul.f32 %v676_v28, %v303_v16 }
 0x278   :  { %v319_v31 = vmul.f32 %v318_v27, %v314_v29 }
 0x27a   :  { %v324_v32 = vadd.f32 %v323_v30, %v319_v31 }
 0x27c   :  { %v325_v33 = vmax.f32 %v324_v32, 0.0 }
 0x27e   :  { %588 = vmatmul.mubr.f32.vlgmr.msra.gmra.mrb[2].mxu0 %v325_v33 }
 0x351   :  { %v412_v36 = vpop.f32.mrb[2].mxu0 }
 0x352   :  { %v413_v37 = vadd.f32 %v412_v36, %v345_v35  ;;  %v589_v38 = vpop.f32.mrb[3].mxu0 }
 0x354   :  { %677 = vtanh.f32 %v413_v37 }
 0x35e   :  { %v678_v39 = vpop.eup %677 }
 0x35f   :  { %417 = vst [vmem:[#allocation8] sm:$0xff] %v678_v39 }
 0x360   :  { %756 = shalt.err (!%p753_p0)
}
 0x361   :  { %s757_s10 = scalar_lea.hbm %s935_s5, 128 }
 0x362   :  { %p758_p1 = scmp.ne.s32.totalorder %s935_s5, %s757_s10  ;;  %p761_p2 = scmp.lt.u32.totalorder %s757_s10, %s935_s5 }
 0x364   :  { %p763_p3 = pnand %p761_p2, %p758_p1 }
 0x366   :  { %766 = shalt.err (!%p763_p3)
}
 0x367   :  { %427 = dma.vmem_to_hbm [thread:$0]  %s425_s6, 128, %s935_s5, [#allocation4]  }
 0x368   :  { %771 = dma.done.wait [#allocation4], 128  }
 0x369   :  { %772 = vsyncadd [#allocation4], 4294967168 }
 0x36a   :  { %431 = vsyncpa [#allocation3], 1 }
 0x36b   :  { %432 = vsyncpa [#allocation6], 1 }
 0x36c   :  { %433 = vsyncpa [#allocation4], 1 }

</bundles_post_ra>
